<compile_context>
chip_gen: v5e
topology: v5e:2x2
jax: 0.10.0
libtpu: 0.0.40
codegen_flags: <defaults>
</compile_context>

<pallas_src>
import functools

import jax
import jax.numpy as jnp
from jax import lax
from jax.experimental import pallas as pl
from jax.experimental.pallas import tpu as pltpu

IGNORE_LB = 255


def _ce_kernel(logits_ref, labels_ref, out_ref):
    """Process one (C, T) logits tile / (1, T) labels tile of image n.

    Accumulates per-pixel losses into the resident (1, T) output row for
    image n; wrapper performs the final sum and division by N*H*W.
    """
    i = pl.program_id(1)

    @pl.when(i == 0)
    def _():
        out_ref[...] = jnp.zeros_like(out_ref)

    x = logits_ref[...].astype(jnp.float32)                 # (C, T)
    lbl = labels_ref[...]                                    # (1, T) int32

    # numerically stable log-softmax over the class (sublane) axis
    m = jnp.max(x, axis=0, keepdims=True)                    # (1, T)
    lse = jnp.log(jnp.sum(jnp.exp(x - m), axis=0, keepdims=True)) + m

    # pick the logit at the target class via one-hot select (C is small)
    cls = lax.broadcasted_iota(jnp.int32, x.shape, 0)         # (C, T)
    picked = jnp.sum(jnp.where(cls == lbl, x, 0.0), axis=0, keepdims=True)

    # per-pixel CE; ignored pixels contribute 0 (matches torch 'none' output)
    loss = jnp.where(lbl != IGNORE_LB, lse - picked, 0.0)     # (1, T)

    # lane-dense VALU-only accumulation into the resident output row
    out_ref[...] += loss


def _round_up(x, m):
    return (x + m - 1) // m * m


@functools.partial(jax.jit, static_argnames=("tile_hw",))
def normal_loss(logits, labels, *, tile_hw: int = 8192):
    """logits: (N, C, H, W) float; labels: (N, H, W) int. Returns scalar f32."""
    N, C, H, W = logits.shape
    HW = H * W
    total = N * HW  # mean denominator = ALL pixels, incl. ignored ones

    # lane tile: multiple of 128, no larger than the (128-padded) pixel count
    t = min(_round_up(tile_hw, 128), _round_up(HW, 128))
    hw_pad = _round_up(HW, t)

    # NCHW -> (N, C, HW): pure reshape, no HBM transpose
    logits_r = logits.reshape(N, C, HW)
    labels_r = labels.reshape(N, 1, HW).astype(jnp.int32)
    if hw_pad != HW:
        pad = hw_pad - HW
        logits_r = jnp.pad(logits_r, ((0, 0), (0, 0), (0, pad)))
        labels_r = jnp.pad(labels_r, ((0, 0), (0, 0), (0, pad)),
                           constant_values=IGNORE_LB)

    n_tiles = hw_pad // t

    # explicit VMEM budget: double-buffered logits (sublane-padded C) +
    # labels + resident output, with headroom; capped below v7x physical 64MiB
    c_pad = _round_up(C, 8)
    est = 2 * (c_pad + 8 + 8) * t * 4
    vmem_limit = int(min(max(2 * est + (8 << 20), 32 << 20), 64 << 20))

    partial = pl.pallas_call(
        _ce_kernel,
        out_shape=jax.ShapeDtypeStruct((N, 1, t), jnp.float32),
        grid_spec=pltpu.PrefetchScalarGridSpec(
            num_scalar_prefetch=0,
            grid=(N, n_tiles),
            in_specs=[
                pl.BlockSpec((None, C, t), lambda n, i: (n, 0, i)),
                pl.BlockSpec((None, 1, t), lambda n, i: (n, 0, i)),
            ],
            out_specs=pl.BlockSpec((None, 1, t), lambda n, i: (n, 0, 0)),
        ),
        compiler_params=pltpu.CompilerParams(
            dimension_semantics=("parallel", "arbitrary"),
            vmem_limit_bytes=vmem_limit,
        ),
    )(logits_r, labels_r)

    # single finalize: one reduce + one scale (outside the hot loop)
    return jnp.sum(partial) / jnp.float32(total)


def _reference_loss(logits, labels):
    # pure-JAX reference of CrossEntropyLoss(ignore_index=255, 'none') + mean
    N, C, H, W = logits.shape
    x = jnp.transpose(logits, (0, 2, 3, 1)).reshape(-1, C).astype(jnp.float32)
    lbl = labels.reshape(-1)
    lse = jax.nn.logsumexp(x, axis=-1)
    safe = jnp.where(lbl == IGNORE_LB, 0, lbl)
    picked = jnp.take_along_axis(x, safe[:, None], axis=-1)[:, 0]
    loss = jnp.where(lbl == IGNORE_LB, 0.0, lse - picked)
    return jnp.mean(loss)


if __name__ == "__main__":
    key = jax.random.PRNGKey(0)
    k1, k2, k3, k4, k5 = jax.random.split(key, 5)

    # primary shape: batch=2, classes=4, 16x16 spatial
    N, C, H, W = 2, 4, 16, 16
    logits = jax.random.normal(k1, (N, C, H, W), dtype=jnp.float32)
    labels = jax.random.randint(k2, (N, H, W), 0, C, dtype=jnp.int32)
    ignore_mask = jax.random.bernoulli(k3, 0.1, (N, H, W))
    labels = jnp.where(ignore_mask, IGNORE_LB, labels)

    loss = normal_loss(logits, labels)
    jax.block_until_ready(loss)
    ref = _reference_loss(logits, labels)
    assert jnp.allclose(loss, ref, atol=1e-5, rtol=1e-5), (loss, ref)

    # tail path: pixel count not a multiple of 128 (exercises ignore-padding)
    N2, C2, H2, W2 = 1, 3, 5, 7
    logits2 = jax.random.normal(k4, (N2, C2, H2, W2), dtype=jnp.float32)
    labels2 = jax.random.randint(k5, (N2, H2, W2), 0, C2, dtype=jnp.int32)
    loss2 = normal_loss(logits2, labels2)
    jax.block_until_ready(loss2)
    ref2 = _reference_loss(logits2, labels2)
    assert jnp.allclose(loss2, ref2, atol=1e-5, rtol=1e-5), (loss2, ref2)

    print("KERNEL_OK")
</pallas_src>

<mosaic_0001>
module attributes {stable_mosaic.version = 11 : i64} {
  func.func @_ce_kernel(%arg0: i32, %arg1: i32, %arg2: memref<1x4x256xf32, #tpu.memory_space<vmem>>, %arg3: memref<1x1x256xi32, #tpu.memory_space<vmem>>, %arg4: memref<1x1x256xf32, #tpu.memory_space<vmem>>) attributes {dimension_semantics = [#tpu.dimension_semantics<parallel>, #tpu.dimension_semantics<arbitrary>], iteration_bounds = array<i64: 2, 1>, scalar_prefetch = 0 : i64, scratch_operands = 0 : i64, tpu.core_type = #tpu.core_type<tc>, window_params = [{transform_indices = @transform_0, window_bounds = array<i64: 1, 4, 256>}, {transform_indices = @transform_1, window_bounds = array<i64: 1, 1, 256>}, {transform_indices = @transform_2, window_bounds = array<i64: 1, 1, 256>}]} {
    %c0_i32 = arith.constant 0 : i32
    %0 = arith.cmpi eq, %arg1, %c0_i32 : i32
    %1 = arith.extui %0 : i1 to i32
    %c0_i32_0 = arith.constant 0 : i32
    %2 = arith.cmpi ne, %1, %c0_i32_0 : i32
    scf.if %2 {
      %cst_16 = arith.constant 0.000000e+00 : f32
      %34 = vector.broadcast %cst_16 : f32 to vector<1x256xf32>
      %c0_17 = arith.constant 0 : index
      %c0_18 = arith.constant 0 : index
      %c0_19 = arith.constant 0 : index
      %35 = vector.load %arg4[%c0_17, %c0_18, %c0_19] : memref<1x1x256xf32, #tpu.memory_space<vmem>>, vector<1x1x256xf32>
      %36 = vector.shape_cast %35 : vector<1x1x256xf32> to vector<1x256xf32>
      %37 = vector.shape_cast %34 : vector<1x256xf32> to vector<1x1x256xf32>
      tpu.vector_store %arg4[%c0_17, %c0_18, %c0_19], %37 {strides = array<i32>} : memref<1x1x256xf32, #tpu.memory_space<vmem>>, vector<1x1x256xf32>,
    } else {
    }
    %c0 = arith.constant 0 : index
    %c0_1 = arith.constant 0 : index
    %c0_2 = arith.constant 0 : index
    %3 = vector.load %arg2[%c0, %c0_1, %c0_2] : memref<1x4x256xf32, #tpu.memory_space<vmem>>, vector<1x4x256xf32>
    %4 = vector.shape_cast %3 : vector<1x4x256xf32> to vector<4x256xf32>
    %c0_3 = arith.constant 0 : index
    %c0_4 = arith.constant 0 : index
    %c0_5 = arith.constant 0 : index
    %5 = vector.load %arg3[%c0_3, %c0_4, %c0_5] : memref<1x1x256xi32, #tpu.memory_space<vmem>>, vector<1x1x256xi32>
    %6 = vector.shape_cast %5 : vector<1x1x256xi32> to vector<1x256xi32>
    %cst = arith.constant dense<0xFF800000> : vector<256xf32>
    %7 = vector.multi_reduction <maximumf>, %4, %cst [0] : vector<4x256xf32> to vector<256xf32>
    %8 = vector.shape_cast %7 : vector<256xf32> to vector<1x256xf32>
    %9 = vector.broadcast %8 : vector<1x256xf32> to vector<4x256xf32>
    %10 = arith.subf %4, %9 : vector<4x256xf32>
    %11 = math.exp %10 : vector<4x256xf32>
    %cst_6 = arith.constant dense<0.000000e+00> : vector<256xf32>
    %12 = vector.multi_reduction <add>, %11, %cst_6 [0] : vector<4x256xf32> to vector<256xf32>
    %13 = vector.shape_cast %12 : vector<256xf32> to vector<1x256xf32>
    %14 = math.log %13 : vector<1x256xf32>
    %15 = arith.addf %14, %8 : vector<1x256xf32>
    %16 = tpu.iota {dimensions = array<i32: 0>} : vector<4x256xi32>
    %17 = vector.broadcast %6 : vector<1x256xi32> to vector<4x256xi32>
    %18 = arith.cmpi eq, %16, %17 : vector<4x256xi32>
    %cst_7 = arith.constant 0.000000e+00 : f32
    %19 = vector.broadcast %cst_7 : f32 to vector<4x256xf32>
    %20 = arith.select %18, %4, %19 : vector<4x256xi1>, vector<4x256xf32>
    %cst_8 = arith.constant dense<0.000000e+00> : vector<256xf32>
    %21 = vector.multi_reduction <add>, %20, %cst_8 [0] : vector<4x256xf32> to vector<256xf32>
    %22 = vector.shape_cast %21 : vector<256xf32> to vector<1x256xf32>
    %c255_i32 = arith.constant 255 : i32
    %23 = vector.broadcast %c255_i32 : i32 to vector<1x256xi32>
    %24 = arith.cmpi ne, %6, %23 : vector<1x256xi32>
    %25 = arith.subf %15, %22 : vector<1x256xf32>
    %cst_9 = arith.constant 0.000000e+00 : f32
    %26 = vector.broadcast %cst_9 : f32 to vector<1x256xf32>
    %27 = arith.select %24, %25, %26 : vector<1x256xi1>, vector<1x256xf32>
    %c0_10 = arith.constant 0 : index
    %c0_11 = arith.constant 0 : index
    %c0_12 = arith.constant 0 : index
    %28 = vector.load %arg4[%c0_10, %c0_11, %c0_12] : memref<1x1x256xf32, #tpu.memory_space<vmem>>, vector<1x1x256xf32>
    %29 = vector.shape_cast %28 : vector<1x1x256xf32> to vector<1x256xf32>
    %30 = arith.addf %29, %27 : vector<1x256xf32>
    %c0_13 = arith.constant 0 : index
    %c0_14 = arith.constant 0 : index
    %c0_15 = arith.constant 0 : index
    %31 = vector.load %arg4[%c0_13, %c0_14, %c0_15] : memref<1x1x256xf32, #tpu.memory_space<vmem>>, vector<1x1x256xf32>
    %32 = vector.shape_cast %31 : vector<1x1x256xf32> to vector<1x256xf32>
    %33 = vector.shape_cast %30 : vector<1x256xf32> to vector<1x1x256xf32>
    tpu.vector_store %arg4[%c0_13, %c0_14, %c0_15], %33 {strides = array<i32>} : memref<1x1x256xf32, #tpu.memory_space<vmem>>, vector<1x1x256xf32>,
    return
  }
  func.func @transform_0(%arg0: i32, %arg1: i32) -> (i32, i32, i32) {
    %c0_i32 = arith.constant 0 : i32
    %c0_i32_0 = arith.constant 0 : i32
    return %arg0, %c0_i32, %arg1 : i32, i32, i32
  }
  func.func @transform_1(%arg0: i32, %arg1: i32) -> (i32, i32, i32) {
    %c0_i32 = arith.constant 0 : i32
    %c0_i32_0 = arith.constant 0 : i32
    return %arg0, %c0_i32, %arg1 : i32, i32, i32
  }
  func.func @transform_2(%arg0: i32, %arg1: i32) -> (i32, i32, i32) {
    %c0_i32 = arith.constant 0 : i32
    %c0_i32_0 = arith.constant 0 : i32
    %c0_i32_1 = arith.constant 0 : i32
    return %arg0, %c0_i32, %c0_i32_0 : i32, i32, i32
  }
}

</mosaic_0001>

<bundles_post_ra>
// kernel: normal_loss.1
= control target key start
LH: loop header
LB: loop body
LE: loop exit
PB: predicated region body
PF: predicated region fallthrough
CT: control target
= control target key end

     0   :  { %s478_s9 = smov 0   ;;  %s480_s10 = smov 0   ;;  %s538_s0 = inlined_call_operand.vmem [shape: f32[2,4,256], index: 0, kind: input, shape index: {}]   ;;  %s539_s1 = inlined_call_operand.vmem [shape: s32[2,1,256], index: 1, kind: input, shape index: {}]   ;;  %s540_s2 = inlined_call_operand.vmem [shape: f32[2,1,256], index: 2, kind: output, shape index: {}]  }
   0x1   :  { %s482_s11 = smov 0  }
   0x2 LB: > { %s24_s12 = sadd.s32 1, %s456_s10  ;;  %p399_p0 = scmp.ge.s32.totalorder %s460_s11, 1  ;;  %s460_s11 = sphi %s482_s11, %s12_s11   ;;  %s456_s10 = sphi %s480_s10, %s544_s10   ;;  %s452_s9 = sphi %s478_s9, %s543_s9  }
   0x3   : > { %p26_p1 = scmp.ge.s32.totalorder %s24_s12, 2  ;;  %p147_p2 = scmp.lt.s32.totalorder %s460_s11, 3 }
   0x5   : > { %s546_s12 = smov (%p26_p1, %s24_s12), 0  ;;  %p148_p3 = pnand %p399_p0, %p147_p2 }
   0x6   : > { %p181_p4 = scmp.lt.s32.totalorder (!%p148_p3), %s452_s9, 1 }
   0x7   : > { %151 = sbr.rel (%p148_p3) target bundleno = 93 (0x5d), region = 28 }
   0xc   : > { %s548_s9 = smov (!%p181_p4, %s452_s9), 1  ;;  %vm220_vm0 = vcmask 1043456   ;;  %v207_v19 = vlaneseq  ;;  %v462_v23 = vmov 0.0   ;;  %vm302_vm4 = vcmask 1040384  }
   0xd   : > { %s406_s13 = sshll.u32 %s548_s9, 3  ;;  %s402_s17 = sshll.u32 %s548_s9, 1 }
   0xe   : > { %s188_s16 = scalar_lea.vmem %s538_s0, %s406_s13  ;;  %s509_s20 = scalar_lea.vmem %s540_s2, %s402_s17  ;;  %vm511_vm1 = vcmp.lt.s32.totalorder %v207_v19, 256  ;;  %v270_v30 = vshrl.u32 %v207_v19, 7 }
   0xf   : > { %v212_v0 = vld [vmem:[%s188_s16] sm:$0xff]  ;;  %211 = vst.msk [vmem:[%s509_s20] sm:$0x3] %vm511_vm1, %v462_v23  ;;  %s197_s23 = scalar_lea.vmem %s539_s1, %s402_s17 }
  0x10   : > { %215 = vst [vmem:[#allocation1] ss:$2 sm:$0xff] %v212_v0  ;;  %v213_v25 = vld [vmem:[%s197_s23] sm:$0x3] }
  0x11   : > { %v271_v33 = vperm.slane %v213_v25, 0  ;;  %v272_v34 = vperm.slane %v213_v25, 1  ;;  %vm296_vm5 = vcmp.ne.s32.totalorder %v213_v25, 255 }
  0x13   : > { %vm273_vm2 = vcmp.eq.s32.totalorder %v270_v30, %v271_v33  ;;  %vm274_vm3 = vcmp.eq.s32.totalorder %v270_v30, %v272_v34 }
  0x17   : > { %v216_v1 = vld.sshfl [vmem:[#allocation1] sm:$0xff pattern:$0x75316420]  ;;  %v217_v2 = vld.sshfl [vmem:[#allocation1 + $0x8] sm:$0xff pattern:$0x75316420] }
  0x18   : > { %v221_v3 = vsel %vm220_vm0, %v216_v1, -inf  ;;  %v228_v4 = vsel %vm220_vm0, %v217_v2, -inf }
  0x19   : > { %v222_v5 = vrot.slane %v221_v3, 4  ;;  %v229_v6 = vrot.slane %v228_v4, 4 }
  0x1b   : > { %v223_v7 = vmax.f32 %v221_v3, %v222_v5  ;;  %v230_v8 = vmax.f32 %v228_v4, %v229_v6 }
  0x1d   : > { %v224_v9 = vrot.slane %v223_v7, 2  ;;  %v231_v10 = vrot.slane %v230_v8, 2 }
  0x1f   : > { %v225_v11 = vmax.f32 %v223_v7, %v224_v9  ;;  %v232_v12 = vmax.f32 %v230_v8, %v231_v10  ;;  %v306_v8 = vld [vmem:[%s509_s20] sm:$0x3] }
  0x21   : > { %v226_v13 = vrot.slane %v225_v11, 1  ;;  %v233_v14 = vrot.slane %v232_v12, 1 }
  0x23   : > { %v234_v15 = vmax.f32 %v232_v12, %v233_v14  ;;  %v227_v16 = vmax.f32 %v225_v11, %v226_v13 }
  0x25   : > { %v237_v17 = vrot.slane %v234_v15, 4 }
  0x27   : > { %v238_v18 = vsel %vm220_vm0, %v227_v16, %v237_v17 }
  0x28   : > { %v240_v20 = vsub.f32 %v212_v0, %v238_v18 }
  0x2a   : > { %v241_v22 = vmul.f32 1.442695, %v240_v20 }
  0x2c   : > { %432 = vpow2.f32 %v241_v22 }
  0x32   : > { %v433_v24 = vpop.eup %432 }
  0x33   : > { %244 = vst [vmem:[#allocation1] ss:$2 sm:$0xff] %v433_v24 }
  0x3a   : > { %v245_v26 = vld.sshfl [vmem:[#allocation1] sm:$0xff pattern:$0x75316420]  ;;  %v246_v27 = vld.sshfl [vmem:[#allocation1 + $0x8] sm:$0xff pattern:$0x75316420] }
  0x3b   : > { %v249_v28 = vsel %vm220_vm0, %v245_v26, 0.0  ;;  %v256_v29 = vsel %vm220_vm0, %v246_v27, 0.0  ;;  %275 = vst [vmem:[#allocation1] ss:$2 sm:$0xff] %v212_v0 }
  0x3c   : > { %v250_v31 = vrot.slane %v249_v28, 4  ;;  %v257_v32 = vrot.slane %v256_v29, 4 }
  0x3e   : > { %v251_v35 = vadd.f32 %v250_v31, %v249_v28  ;;  %v258_v36 = vadd.f32 %v257_v32, %v256_v29 }
  0x40   : > { %v252_v37 = vrot.slane %v251_v35, 2  ;;  %v259_v38 = vrot.slane %v258_v36, 2 }
  0x42   : > { %v253_v39 = vadd.f32 %v252_v37, %v251_v35  ;;  %v260_v40 = vadd.f32 %v259_v38, %v258_v36  ;;  %v276_v41 = vld.sshfl [vmem:[#allocation1] sm:$0xff pattern:$0x75316420]  ;;  %v277_v42 = vld.sshfl [vmem:[#allocation1 + $0x8] sm:$0xff pattern:$0x75316420] }
  0x43   : > { %v280_v43 = vsel %vm273_vm2, %v276_v41, 0.0  ;;  %v281_v44 = vsel %vm274_vm3, %v277_v42, 0.0 }
  0x44   : > { %v254_v45 = vrot.slane %v253_v39, 1  ;;  %v261_v46 = vrot.slane %v260_v40, 1  ;;  %v282_v47 = vsel %vm220_vm0, %v280_v43, 0.0  ;;  %v289_v48 = vsel %vm220_vm0, %v281_v44, 0.0 }
  0x45   : > { %v283_v49 = vrot.slane %v282_v47, 4  ;;  %v290_v50 = vrot.slane %v289_v48, 4 }
  0x46   : > { %v255_v51 = vadd.f32 %v254_v45, %v253_v39  ;;  %v262_v52 = vadd.f32 %v261_v46, %v260_v40 }
  0x47   : > { %v284_v53 = vadd.f32 %v283_v49, %v282_v47  ;;  %v291_v54 = vadd.f32 %v290_v50, %v289_v48 }
  0x48   : > { %434 = vlog2.f32 %v255_v51 }
  0x49   : > { %436 = vlog2.f32 %v262_v52  ;;  %v285_v55 = vrot.slane %v284_v53, 2  ;;  %v292_v56 = vrot.slane %v291_v54, 2 }
  0x4b   : > { %v293_v57 = vadd.f32 %v292_v56, %v291_v54  ;;  %v286_v58 = vadd.f32 %v285_v55, %v284_v53 }
  0x4d   : > { %v294_v60 = vrot.slane %v293_v57, 1  ;;  %v287_v0 = vrot.slane %v286_v58, 1 }
  0x4e   : > { %v435_v59 = vpop.eup %434 }
  0x4f   : > { %v437_v61 = vpop.eup %436  ;;  %v264_v62 = vmul.f32 0.6931472, %v435_v59  ;;  %v295_v3 = vadd.f32 %v294_v60, %v293_v57  ;;  %v288_v4 = vadd.f32 %v287_v0, %v286_v58 }
  0x50   : > { %v266_v63 = vmul.f32 0.6931472, %v437_v61 }
  0x51   : > { %v267_v1 = vadd.f32 %v264_v62, %v227_v16 }
  0x52   : > { %v268_v2 = vadd.f32 %v266_v63, %v234_v15 }
  0x53   : > { %v297_v6 = vsub.f32 %v267_v1, %v288_v4 }
  0x54   : > { %v298_v5 = vsub.f32 %v268_v2, %v295_v3 }
  0x56   : > { %v301_v7 = vrot.slane %v298_v5, 7 }
  0x58   : > { %v303_v9 = vsel %vm302_vm4, %v297_v6, %v301_v7 }
  0x59   : > { %v305_v10 = vsel %vm296_vm5, %v303_v9, 0.0 }
  0x5a   : > { %v307_v11 = vadd.f32 %v306_v8, %v305_v10 }
  0x5c   : > { %312 = vst.msk [vmem:[%s509_s20] sm:$0x3] %vm511_vm1, %v307_v11 }
  0x5d PF: > { %s12_s11 = sadd.s32 1, %s460_s11   ;;  %s543_s9 = smov %s456_s10 }
  0x5e   : > { %p9_p5 = scmp.ge.s32.totalorder %s12_s11, 4   ;;  %s544_s10 = smov %s546_s12 }
  0x60   :  { %11 = sbr.rel (!%p9_p5) target bundleno = 2 (0x2), region = 65 }

</bundles_post_ra>
